<compile_context>
chip_gen: v5e
topology: v5e:2x2
jax: 0.10.0
libtpu: 0.0.40
codegen_flags: <defaults>
</compile_context>

<pallas_src>
import jax
import jax.numpy as jnp
from jax import lax
from jax.experimental import pallas as pl
from jax.experimental.pallas import tpu as pltpu


_PRECISION = lax.Precision.DEFAULT   # explicit; same in kernel and reference


def critic_kernel(s_ref, a_ref, w1_ref, b1_ref, w2_ref, b2_ref, h2_ref):
    """fc1 (merged K=S+A) -> relu -> fc2 -> relu, lane-dense output.

    s_ref  : (TB, S)   state tile
    a_ref  : (TB, A)   action tile
    w1_ref : (S+A, Hp), b1_ref: (1, Hp)
    w2_ref : (Hp, Hp),  b2_ref: (1, Hp)
    h2_ref : (TB, Hp)  output tile (Hp = hidden padded to a multiple of 128)
    """
    # Single fc1 matmul: lane-concat the two input tiles (no HBM concat).
    x = jnp.concatenate([s_ref[...], a_ref[...]], axis=-1)        # (TB, S+A)
    h1 = jnp.dot(x, w1_ref[...], precision=_PRECISION,
                 preferred_element_type=jnp.float32)
    h1 = jnp.maximum(h1 + b1_ref[...], 0.0)

    h2 = jnp.dot(h1, w2_ref[...], precision=_PRECISION,
                 preferred_element_type=jnp.float32)
    h2_ref[...] = jnp.maximum(h2 + b2_ref[...], 0.0)


def _round_up(x, m):
    return (x + m - 1) // m * m


def prepare_critic_weights(params):
    """Zero-pad the hidden dim to a multiple of 128 (lane-dense output).

    Zero pads keep the real columns exactly equal to the unpadded math:
    b1/b2 pads are 0 (relu(0)=0) and w2's padded rows are 0, so padded
    columns contribute nothing and stay exactly 0.
    Returns (padded fc1/fc2 params, original hidden size).
    """
    w1, b1, w2, b2 = params[:4]      # fc3 params never affect the returned value
    h = w2.shape[1]
    hp = _round_up(h, 128)
    if hp != h:
        w1 = jnp.pad(w1, ((0, 0), (0, hp - h)))
        b1 = jnp.pad(b1, ((0, 0), (0, hp - h)))
        w2 = jnp.pad(w2, ((0, hp - h), (0, hp - h)))
        b2 = jnp.pad(b2, ((0, 0), (0, hp - h)))
    return (w1, b1, w2, b2), h


def critic_forward(state, action, prepared, hidden, tb=1024):
    """Batch-tiled pallas_call; weights stay resident in VMEM."""
    w1, b1, w2, b2 = prepared
    B, S = state.shape
    A = action.shape[1]
    hp = w2.shape[1]

    # Batch tile: multiple of 8 sublanes, capped by the (rounded) batch.
    # Soft cap keeps double-buffered in/out tiles well inside v5e's 16 MiB
    # scoped-VMEM default (v6e/v7x defaults are 32 MiB).
    tb = max(8, min(tb, 8192, _round_up(B, 8)))
    # >=2 grid steps when possible so the "parallel" batch axis can be
    # sharded across v7x's two TensorCores (no-op cost on v5e/v6e).
    if B > 8:
        tb = min(tb, _round_up(-(-B // 2), 8))

    # Grid over-covers B (no jnp.pad of the inputs): out-of-range rows read
    # unspecified data and are dropped on write; rows are independent.
    grid = (pl.cdiv(B, tb),)

    flops = 2 * B * (S + A) * hp + 2 * B * hp * hp
    bytes_accessed = 4 * (B * (S + A) + B * hp
                          + w1.size + b1.size + w2.size + b2.size)

    out = pl.pallas_call(
        critic_kernel,
        grid=grid,
        in_specs=[
            pl.BlockSpec((tb, S), lambda i: (i, 0)),       # state tile
            pl.BlockSpec((tb, A), lambda i: (i, 0)),       # action tile
            pl.BlockSpec(w1.shape, lambda i: (0, 0)),      # resident weights
            pl.BlockSpec(b1.shape, lambda i: (0, 0)),
            pl.BlockSpec(w2.shape, lambda i: (0, 0)),
            pl.BlockSpec(b2.shape, lambda i: (0, 0)),
        ],
        out_specs=pl.BlockSpec((tb, hp), lambda i: (i, 0)),
        out_shape=jax.ShapeDtypeStruct((B, hp), jnp.float32),
        compiler_params=pltpu.CompilerParams(
            dimension_semantics=("parallel",)),
        cost_estimate=pl.CostEstimate(flops=flops, transcendentals=0,
                                      bytes_accessed=bytes_accessed),
    )(state, action, w1, b1, w2, b2)

    # Downstream consumers could keep the padded (B, hp) layout; the demo
    # slices back to the module's (B, hidden) output.
    return out if hp == hidden else out[:, :hidden]


def init_params(key, state_dim, action_dim, hidden_size=64):
    """Deterministic synthetic init (PyTorch-style uniform(-1/sqrt(fan_in)))."""
    def linear(k, fan_in, fan_out):
        kw, kb = jax.random.split(k)
        bound = 1.0 / jnp.sqrt(fan_in)
        # stored as (in, out) so the kernel does x @ W
        w = jax.random.uniform(kw, (fan_in, fan_out), jnp.float32, -bound, bound)
        b = jax.random.uniform(kb, (1, fan_out), jnp.float32, -bound, bound)
        return w, b

    k1, k2, k3 = jax.random.split(key, 3)
    w1, b1 = linear(k1, state_dim + action_dim, hidden_size)
    w2, b2 = linear(k2, hidden_size, hidden_size)
    w3, b3 = linear(k3, hidden_size, 1)
    return (w1, b1, w2, b2, w3, b3)


def reference_forward(state, action, params):
    """Plain-JAX reference replicating the PyTorch forward exactly."""
    w1, b1, w2, b2, w3, b3 = params
    X = jnp.concatenate([state, action], axis=1)
    x = jnp.maximum(jnp.dot(X, w1, precision=_PRECISION) + b1, 0.0)
    x = jnp.maximum(jnp.dot(x, w2, precision=_PRECISION) + b2, 0.0)
    _X = jnp.dot(x, w3, precision=_PRECISION) + b3   # computed, discarded
    return x


if __name__ == "__main__":
    batch = 64
    state_dim = 16
    action_dim = 16
    hidden = 64

    key = jax.random.PRNGKey(0)
    kp, ks, ka = jax.random.split(key, 3)

    params = init_params(kp, state_dim, action_dim, hidden)
    prepared, hidden_size = prepare_critic_weights(params)

    state = jax.random.normal(ks, (batch, state_dim), jnp.float32)
    action = jax.random.normal(ka, (batch, action_dim), jnp.float32)

    out = critic_forward(state, action, prepared, hidden_size)
    out = jax.block_until_ready(out)

    ref = reference_forward(state, action, params)
    assert out.shape == (batch, hidden)
    assert jnp.allclose(out, ref, atol=1e-5, rtol=1e-5), "mismatch vs reference"

    print("KERNEL_OK")
</pallas_src>

<mosaic_0001>
module attributes {stable_mosaic.version = 11 : i64} {
  func.func @critic_kernel(%arg0: i32, %arg1: memref<32x16xf32, #tpu.memory_space<vmem>>, %arg2: memref<32x16xf32, #tpu.memory_space<vmem>>, %arg3: memref<32x128xf32, #tpu.memory_space<vmem>>, %arg4: memref<1x128xf32, #tpu.memory_space<vmem>>, %arg5: memref<128x128xf32, #tpu.memory_space<vmem>>, %arg6: memref<1x128xf32, #tpu.memory_space<vmem>>, %arg7: memref<32x128xf32, #tpu.memory_space<vmem>>) attributes {dimension_semantics = [#tpu.dimension_semantics<parallel>], iteration_bounds = array<i64: 2>, scalar_prefetch = 0 : i64, scratch_operands = 0 : i64, tpu.core_type = #tpu.core_type<tc>, window_params = [{transform_indices = @transform_0, window_bounds = array<i64: 32, 16>}, {transform_indices = @transform_1, window_bounds = array<i64: 32, 16>}, {pipeline_mode = #tpu.pipeline_mode<synchronous>, transform_indices = @transform_2, window_bounds = array<i64: 32, 128>}, {pipeline_mode = #tpu.pipeline_mode<synchronous>, transform_indices = @transform_3, window_bounds = array<i64: 1, 128>}, {pipeline_mode = #tpu.pipeline_mode<synchronous>, transform_indices = @transform_4, window_bounds = array<i64: 128, 128>}, {pipeline_mode = #tpu.pipeline_mode<synchronous>, transform_indices = @transform_5, window_bounds = array<i64: 1, 128>}, {transform_indices = @transform_6, window_bounds = array<i64: 32, 128>}]} {
    %c0 = arith.constant 0 : index
    %c0_0 = arith.constant 0 : index
    %0 = vector.load %arg1[%c0, %c0_0] : memref<32x16xf32, #tpu.memory_space<vmem>>, vector<32x16xf32>
    %c0_1 = arith.constant 0 : index
    %c0_2 = arith.constant 0 : index
    %1 = vector.load %arg2[%c0_1, %c0_2] : memref<32x16xf32, #tpu.memory_space<vmem>>, vector<32x16xf32>
    %2 = tpu.concatenate %0, %1 in 1 : vector<32x16xf32>, vector<32x16xf32> -> vector<32x32xf32>
    %c0_3 = arith.constant 0 : index
    %c0_4 = arith.constant 0 : index
    %3 = vector.load %arg3[%c0_3, %c0_4] : memref<32x128xf32, #tpu.memory_space<vmem>>, vector<32x128xf32>
    %cst = arith.constant dense<0.000000e+00> : vector<32x128xf32>
    %4 = tpu.matmul %2, %3, %cst {dimension_numbers = #tpu.dot_dimension_numbers<[1], [0], [0], [1], [0, 0, 1, 1], [], []>} : vector<32x32xf32>, vector<32x128xf32>, vector<32x128xf32> -> vector<32x128xf32>
    %c0_5 = arith.constant 0 : index
    %c0_6 = arith.constant 0 : index
    %5 = vector.load %arg4[%c0_5, %c0_6] : memref<1x128xf32, #tpu.memory_space<vmem>>, vector<1x128xf32>
    %6 = vector.broadcast %5 : vector<1x128xf32> to vector<32x128xf32>
    %7 = arith.addf %4, %6 : vector<32x128xf32>
    %cst_7 = arith.constant 0.000000e+00 : f32
    %8 = vector.broadcast %cst_7 : f32 to vector<32x128xf32>
    %9 = arith.maximumf %7, %8 : vector<32x128xf32>
    %c0_8 = arith.constant 0 : index
    %c0_9 = arith.constant 0 : index
    %10 = vector.load %arg5[%c0_8, %c0_9] : memref<128x128xf32, #tpu.memory_space<vmem>>, vector<128x128xf32>
    %cst_10 = arith.constant dense<0.000000e+00> : vector<32x128xf32>
    %11 = tpu.matmul %9, %10, %cst_10 {dimension_numbers = #tpu.dot_dimension_numbers<[1], [0], [0], [1], [0, 0, 1, 1], [], []>} : vector<32x128xf32>, vector<128x128xf32>, vector<32x128xf32> -> vector<32x128xf32>
    %c0_11 = arith.constant 0 : index
    %c0_12 = arith.constant 0 : index
    %12 = vector.load %arg6[%c0_11, %c0_12] : memref<1x128xf32, #tpu.memory_space<vmem>>, vector<1x128xf32>
    %13 = vector.broadcast %12 : vector<1x128xf32> to vector<32x128xf32>
    %14 = arith.addf %11, %13 : vector<32x128xf32>
    %cst_13 = arith.constant 0.000000e+00 : f32
    %15 = vector.broadcast %cst_13 : f32 to vector<32x128xf32>
    %16 = arith.maximumf %14, %15 : vector<32x128xf32>
    %c0_14 = arith.constant 0 : index
    %c0_15 = arith.constant 0 : index
    %17 = vector.load %arg7[%c0_14, %c0_15] : memref<32x128xf32, #tpu.memory_space<vmem>>, vector<32x128xf32>
    tpu.vector_store %arg7[%c0_14, %c0_15], %16 {strides = array<i32>} : memref<32x128xf32, #tpu.memory_space<vmem>>, vector<32x128xf32>,
    return
  }
  func.func @transform_0(%arg0: i32) -> (i32, i32) {
    %c0_i32 = arith.constant 0 : i32
    %c0_i32_0 = arith.constant 0 : i32
    return %arg0, %c0_i32 : i32, i32
  }
  func.func @transform_1(%arg0: i32) -> (i32, i32) {
    %c0_i32 = arith.constant 0 : i32
    %c0_i32_0 = arith.constant 0 : i32
    return %arg0, %c0_i32 : i32, i32
  }
  func.func @transform_2(%arg0: i32) -> (i32, i32) {
    %c0_i32 = arith.constant 0 : i32
    %c0_i32_0 = arith.constant 0 : i32
    %c0_i32_1 = arith.constant 0 : i32
    return %c0_i32, %c0_i32_0 : i32, i32
  }
  func.func @transform_3(%arg0: i32) -> (i32, i32) {
    %c0_i32 = arith.constant 0 : i32
    %c0_i32_0 = arith.constant 0 : i32
    %c0_i32_1 = arith.constant 0 : i32
    return %c0_i32, %c0_i32_0 : i32, i32
  }
  func.func @transform_4(%arg0: i32) -> (i32, i32) {
    %c0_i32 = arith.constant 0 : i32
    %c0_i32_0 = arith.constant 0 : i32
    %c0_i32_1 = arith.constant 0 : i32
    return %c0_i32, %c0_i32_0 : i32, i32
  }
  func.func @transform_5(%arg0: i32) -> (i32, i32) {
    %c0_i32 = arith.constant 0 : i32
    %c0_i32_0 = arith.constant 0 : i32
    %c0_i32_1 = arith.constant 0 : i32
    return %c0_i32, %c0_i32_0 : i32, i32
  }
  func.func @transform_6(%arg0: i32) -> (i32, i32) {
    %c0_i32 = arith.constant 0 : i32
    %c0_i32_0 = arith.constant 0 : i32
    return %arg0, %c0_i32 : i32, i32
  }
}

</mosaic_0001>

<bundles_post_ra>
// kernel: tpu_custom_call.1
= control target key start
LH: loop header
LB: loop body
LE: loop exit
PB: predicated region body
PF: predicated region fallthrough
CT: control target
= control target key end

     0   :  { %11 = vsyncpa [#allocation3], 0  ;;  %s869_s0 = inlined_call_operand.vmem [shape: f32[64,16], index: 0, kind: input, shape index: {}]   ;;  %s870_s1 = inlined_call_operand.vmem [shape: f32[64,16], index: 1, kind: input, shape index: {}]   ;;  %s871_s2 = inlined_call_operand.vmem [shape: f32[32,128], index: 2, kind: input, shape index: {}]   ;;  %s872_s3 = inlined_call_operand.vmem [shape: f32[1,128], index: 3, kind: input, shape index: {}]   ;;  %s873_s4 = inlined_call_operand.vmem [shape: f32[128,128], index: 4, kind: input, shape index: {}]   ;;  %s874_s5 = inlined_call_operand.vmem [shape: f32[1,128], index: 5, kind: input, shape index: {}]   ;;  %s875_s6 = inlined_call_operand.hbm [shape: f32[64,128], index: 6, kind: output, shape index: {}]  }
   0x1   :  { %13 = vsyncpa [#allocation3 + $0x1], 0  ;;  %s702_s21 = smov 0   ;;  %s704_s22 = smov 0  }
   0x2   :  { %s706_s23 = smov 0   ;;  %s708_s24 = smov 0  }
   0x3 LB: > { %s723_s25 = sadd.s32 4294967295, %s662_s24   ;;  %s505_s26 = sadd.s32 4294967294, %s662_s24   ;;  %s662_s24 = sphi %s708_s24, %s881_s24   ;;  %s658_s23 = sphi %s706_s23, %s880_s23   ;;  %s654_s22 = sphi %s704_s22, %s879_s22   ;;  %s650_s21 = sphi %s702_s21, %s878_s21  }
   0x4   : > { %s727_s27 = sadd.s32 1, %s662_s24   ;;  %s162_s28 = sadd.s32 1, %s658_s23 }
   0x5   : > { %s159_s29 = ssub.s32 %s662_s24, %s727_s27  ;;  %p172_p0 = scmp.ne.s32.totalorder %s658_s23, %s654_s22 }
   0x6   : > { %p160_p1 = scmp.eq.s32.totalorder %s159_s29, 0  ;;  %p173_p2 = scmp.eq.s32.totalorder %s723_s25, 1 }
   0x7   : > { %p178_p3 = scmp.ne.s32.totalorder %s654_s22, %s650_s21  ;;  %p179_p4 = scmp.eq.s32.totalorder %s505_s26, 1 }
   0x8   : > { %s738_s30 = scalar_select %p160_p1, %s658_s23, %s162_s28  }
   0x9   : > { %p740_p5 = por %p173_p2, %p172_p0  ;;  %p744_p6 = por %p179_p4, %p178_p3 }
   0xa   : > { %p508_p7 = scmp.ge.s32.totalorder %s662_s24, 1  ;;  %p227_p8 = scmp.lt.s32.totalorder %s662_s24, 3 }
   0xc   : > { %p228_p9 = pnand %p508_p7, %p227_p8 }
   0xd   : > { %s510_s9 = sshll.u32 (!%p228_p9), %s723_s25, 2  ;;  %s664_s20 = smov (!%p228_p9), 16  }
   0xe   : > { %231 = sbr.rel (%p228_p9) target bundleno = 433 (0x1b1), region = 44  ;;  %p263_p10 = scmp.lt.s32.totalorder (!%p228_p9), %s510_s9, 7 }
   0xf   : > { %s259_s17 = sand.u32 (!%p228_p9), 1, %s654_s22   ;;  %s523_s26 = sshll.u32 (!%p228_p9), %s723_s25, 5 }
  0x10   : > { %s416_s12 = scalar_lea.sflag (!%p228_p9), [#allocation3], %s259_s17  ;;  %s620_s18 = scalar_lea.hbm (!%p228_p9), %s875_s6, 64 }
  0x13   : > { %v307_v0 = vld [vmem:[%s871_s2 + $0x18] sm:$0xff]  ;;  %v306_v1 = vld [vmem:[%s871_s2 + $0x10] sm:$0xff]  ;;  %v305_v2 = vld [vmem:[%s871_s2 + $0x8] sm:$0xff]  ;;  %s883_s9 = smov (!%p263_p10, %s510_s9), 7  ;;  %vm299_vm0 = vcmask 130048   ;;  %vm312_vm1 = vcmask 261120  }
  0x14   : > { %337 = vmatpush.msra.mxu0 %v307_v0  ;;  %s511_s16 = sshll.u32 %s883_s9, 3  ;;  %v304_v7 = vld [vmem:[%s871_s2] sm:$0xff]  ;;  %v373_v8 = vld [vmem:[%s873_s4 + $0x78] sm:$0xff]  ;;  %v372_v9 = vld [vmem:[%s873_s4 + $0x70] sm:$0xff]  ;;  %s427_s9 = scalar_lea.hbm %s875_s6, %s523_s26 }
  0x15   : > { %s272_s19 = scalar_lea.vmem %s870_s1, %s511_s16  ;;  %s775_s14 = scalar_lea.vmem %s869_s0, %s511_s16  ;;  %378 = vmatpush.msra.mxu1 %v373_v8  ;;  %524 = vmatpush.msra.mxu2 %v373_v8  ;;  %v371_v10 = vld [vmem:[%s873_s4 + $0x68] sm:$0xff]  ;;  %v370_v12 = vld [vmem:[%s873_s4 + $0x60] sm:$0xff]  ;;  %v369_v14 = vld [vmem:[%s873_s4 + $0x58] sm:$0xff] }
  0x16   : > { %338 = vmatpush.msra.mxu0 %v306_v1  ;;  %v279_v3 = vld [vmem:[%s272_s19] sm:$0xff]  ;;  %v281_v4 = vld [vmem:[%s272_s19 + $0x10] sm:$0xff]  ;;  %v280_v5 = vld [vmem:[%s272_s19 + $0x8] sm:$0xff]  ;;  %525 = vmatpush.msra.mxu3 %v373_v8  ;;  %s509_s16 = sshll.u32 %s259_s17, 5  ;;  %s430_s11 = sshll.u32 %s427_s9, 4  ;;  %s431_s11 = int_to_ptr.hbm [resolvable:$true] %s430_s11 }
  0x17   : > { %287 = vrot.lane.b32.xlu0 %v279_v3, %s664_s20  ;;  %291 = vrot.lane.b32.xlu1 %v281_v4, %s664_s20  ;;  %v282_v6 = vld [vmem:[%s272_s19 + $0x18] sm:$0xff]  ;;  %v275_v11 = vld [vmem:[%s775_s14] sm:$0xff] }
  0x18   : > { %339 = vmatpush.msra.mxu0 %v305_v2  ;;  %379 = vmatpush.msra.mxu1 %v372_v9  ;;  %v368_v16 = vld [vmem:[%s873_s4 + $0x50] sm:$0xff]  ;;  %v367_v17 = vld [vmem:[%s873_s4 + $0x48] sm:$0xff]  ;;  %v366_v19 = vld [vmem:[%s873_s4 + $0x40] sm:$0xff] }
  0x19   : > { %526 = vmatpush.msra.mxu2 %v372_v9  ;;  %527 = vmatpush.msra.mxu3 %v372_v9  ;;  %v276_v18 = vld [vmem:[%s775_s14 + $0x8] sm:$0xff]  ;;  %v365_v21 = vld [vmem:[%s873_s4 + $0x38] sm:$0xff]  ;;  %v364_v24 = vld [vmem:[%s873_s4 + $0x30] sm:$0xff] }
  0x1a   : > { %340 = vmatpush.msra.mxu0 %v304_v7  ;;  %380 = vmatpush.msra.mxu1 %v371_v10  ;;  %v277_v25 = vld [vmem:[%s775_s14 + $0x10] sm:$0xff]  ;;  %v363_v26 = vld [vmem:[%s873_s4 + $0x28] sm:$0xff]  ;;  %v362_v27 = vld [vmem:[%s873_s4 + $0x20] sm:$0xff] }
  0x1b   : > { %528 = vmatpush.msra.mxu2 %v371_v10  ;;  %529 = vmatpush.msra.mxu3 %v371_v10  ;;  %v361_v29 = vld [vmem:[%s873_s4 + $0x18] sm:$0xff]  ;;  %v360_v33 = vld [vmem:[%s873_s4 + $0x10] sm:$0xff]  ;;  %v359_v34 = vld [vmem:[%s873_s4 + $0x8] sm:$0xff] }
  0x1c   : > { %381 = vmatpush.msra.mxu1 %v370_v12  ;;  %v278_v31 = vld [vmem:[%s775_s14 + $0x18] sm:$0xff]  ;;  %v358_v35 = vld [vmem:[%s873_s4] sm:$0xff]  ;;  %s614_s14 = sshra.s32 %s431_s11, 4  ;;  %s615_s14 = int_to_ptr.hbm [resolvable:$true] %s614_s14 }
  0x1d   : > { %530 = vmatpush.msra.mxu2 %v370_v12  ;;  %531 = vmatpush.msra.mxu3 %v370_v12  ;;  %v598_v36 = vld [vmem:[%s872_s3] ss:$0 sm:$0xff]  ;;  %s616_s13 = scalar_lea.hbm %s615_s14, 32  ;;  %p621_p0 = scmp.lt.s32.totalorder %s615_s14, %s875_s6 }
  0x1e   : > { %382 = vmatpush.msra.mxu1 %v369_v14  ;;  %v599_v49 = vld [vmem:[%s874_s5] ss:$0 sm:$0xff]  ;;  %p617_p11 = scmp.ne.s32.totalorder %s615_s14, %s616_s13  ;;  %p622_p1 = scmp.lt.s32.totalorder %s620_s18, %s616_s13 }
  0x1f   : > { %289 = vrot.lane.b32.xlu0 %v280_v5, %s664_s20  ;;  %293 = vrot.lane.b32.xlu1 %v282_v6, %s664_s20  ;;  %s261_s20 = scalar_lea.vmem [#allocation2], %s509_s16 }
  0x20   : > { %532 = vmatpush.msra.mxu2 %v369_v14  ;;  %533 = vmatpush.msra.mxu3 %v369_v14  ;;  %s428_s10 = sshll.u32 %s261_s20, 4  ;;  %p618_p12 = pnand %p617_p11, %p740_p5  ;;  %s429_s10 = int_to_ptr.vmem [resolvable:$true] %s428_s10 }
  0x21   : > { %383 = vmatpush.msra.mxu1 %v368_v16  ;;  %p623_p2 = por %p622_p1, %p621_p0 }
  0x22   : > { %534 = vmatpush.msra.mxu2 %v368_v16  ;;  %535 = vmatpush.msra.mxu3 %v368_v16  ;;  %p619_p13 = pneg %p618_p12 }
  0x23   : > { %384 = vmatpush.msra.mxu1 %v367_v17 }
  0x24   : > { %536 = vmatpush.msra.mxu2 %v367_v17  ;;  %537 = vmatpush.msra.mxu3 %v367_v17  ;;  %p624_p3 = pnand %p623_p2, %p619_p13 }
  0x25   : > { %385 = vmatpush.msra.mxu1 %v366_v19 }
  0x26   : > { %538 = vmatpush.msra.mxu2 %v366_v19  ;;  %539 = vmatpush.msra.mxu3 %v366_v19 }
  0x27   : > { %386 = vmatpush.msra.mxu1 %v365_v21 }
  0x28   : > { %540 = vmatpush.msra.mxu2 %v365_v21  ;;  %541 = vmatpush.msra.mxu3 %v365_v21 }
  0x29   : > { %387 = vmatpush.msra.mxu1 %v364_v24 }
  0x2a   : > { %542 = vmatpush.msra.mxu2 %v364_v24  ;;  %543 = vmatpush.msra.mxu3 %v364_v24 }
  0x2b   : > { %388 = vmatpush.msra.mxu1 %v363_v26 }
  0x2c   : > { %544 = vmatpush.msra.mxu2 %v363_v26  ;;  %545 = vmatpush.msra.mxu3 %v363_v26 }
  0x2d   : > { %389 = vmatpush.msra.mxu1 %v362_v27 }
  0x2e   : > { %546 = vmatpush.msra.mxu2 %v362_v27  ;;  %547 = vmatpush.msra.mxu3 %v362_v27 }
  0x2f   : > { %390 = vmatpush.msra.mxu1 %v361_v29 }
  0x30   : > { %548 = vmatpush.msra.mxu2 %v361_v29  ;;  %549 = vmatpush.msra.mxu3 %v361_v29 }
  0x31   : > { %391 = vmatpush.msra.mxu1 %v360_v33 }
  0x32   : > { %550 = vmatpush.msra.mxu2 %v360_v33  ;;  %551 = vmatpush.msra.mxu3 %v360_v33 }
  0x33   : > { %392 = vmatpush.msra.mxu1 %v359_v34 }
  0x34   : > { %552 = vmatpush.msra.mxu2 %v359_v34  ;;  %553 = vmatpush.msra.mxu3 %v359_v34 }
  0x35   : > { %393 = vmatpush.msra.mxu1 %v358_v35 }
  0x36   : > { %554 = vmatpush.msra.mxu2 %v358_v35  ;;  %555 = vmatpush.msra.mxu3 %v358_v35 }
  0x89   : > { %v288_v13 = vpop.permute.xlu0 %287  ;;  %v292_v23 = vpop.permute.xlu1 %291 }
  0x8a   : > { %v300_v15 = vsel %vm299_vm0, %v275_v11, %v288_v13  ;;  %v302_v28 = vsel %vm299_vm0, %v277_v25, %v292_v23 }
  0x8b   : > { %514 = vmatmul.msk.f32.vlgmr.msra.gmra.mxu0 %vm312_vm1, %v300_v15 }
  0x91   : > { %v290_v20 = vpop.permute.xlu0 %289  ;;  %v294_v30 = vpop.permute.xlu1 %293 }
  0x92   : > { %v301_v22 = vsel %vm299_vm0, %v276_v18, %v290_v20  ;;  %v303_v32 = vsel %vm299_vm0, %v278_v31, %v294_v30 }
  0x93   : > { %515 = vmatmul.msk.f32.gmra.mxu0 %vm312_vm1, %v301_v22 }
  0x9b   : > { %516 = vmatmul.msk.f32.gmra.mxu0 %vm312_vm1, %v302_v28 }
  0xa3   : > { %517 = vmatmul.msk.f32.gmra.mxu0 %vm312_vm1, %v303_v32 }
 0x108   : > { %v342_v37 = vpop.f32.mrf.mxu0 }
 0x109   : > { %v343_v38 = vadd.f32 %v598_v36, %v342_v37 }
 0x10b   : > { %v354_v39 = vmax.f32 %v343_v38, 0.0 }
 0x10d   : > { %394 = vmatmul.f32.vlgmr.msra.gmra.mxu1 %v354_v39 }
 0x110   : > { %v345_v40 = vpop.f32.mrf.mxu0 }
 0x111   : > { %v346_v41 = vadd.f32 %v598_v36, %v345_v40 }
 0x113   : > { %v355_v42 = vmax.f32 %v346_v41, 0.0 }
 0x115   : > { %397 = vmatmul.f32.vlgmr.msra.gmra.mxu2 %v355_v42 }
 0x118   : > { %v348_v43 = vpop.f32.mrf.mxu0 }
 0x119   : > { %v349_v44 = vadd.f32 %v598_v36, %v348_v43 }
 0x11b   : > { %v356_v45 = vmax.f32 %v349_v44, 0.0 }
 0x11d   : > { %400 = vmatmul.f32.vlgmr.msra.gmra.mxu3 %v356_v45 }
 0x120   : > { %v351_v46 = vpop.f32.mrf.mxu0 }
 0x121   : > { %v352_v47 = vadd.f32 %v598_v36, %v351_v46 }
 0x123   : > { %v357_v48 = vmax.f32 %v352_v47, 0.0 }
 0x125   : > { %403 = vmatmul.f32.gmra.mxu3 %v357_v48 }
 0x18a   : > { %v395_v50 = vpop.f32.mrf.mxu1 }
 0x18b   : > { %v396_v51 = vadd.f32 %v599_v49, %v395_v50 }
 0x18d   : > { %v407_v52 = vmax.f32 %v396_v51, 0.0 }
 0x18f   : > { %411 = vst [vmem:[%s261_s20] sm:$0xff] %v407_v52 }
 0x198   : > { %v398_v53 = vpop.f32.mrf.mxu2 }
 0x199   : > { %v399_v54 = vadd.f32 %v599_v49, %v398_v53 }
 0x19b   : > { %v408_v55 = vmax.f32 %v399_v54, 0.0 }
 0x19d   : > { %412 = vst [vmem:[%s261_s20 + $0x8] sm:$0xff] %v408_v55 }
 0x1a0   : > { %v401_v56 = vpop.f32.mrf.mxu3 }
 0x1a1   : > { %v402_v57 = vadd.f32 %v599_v49, %v401_v56 }
 0x1a3   : > { %v409_v58 = vmax.f32 %v402_v57, 0.0 }
 0x1a5   : > { %413 = vst [vmem:[%s261_s20 + $0x10] sm:$0xff] %v409_v58 }
 0x1a8   : > { %v404_v59 = vpop.f32.mrf.mxu3 }
 0x1a9   : > { %v405_v60 = vadd.f32 %v599_v49, %v404_v59 }
 0x1ab   : > { %v410_v61 = vmax.f32 %v405_v60, 0.0 }
 0x1ad   : > { %414 = vst [vmem:[%s261_s20 + $0x18] sm:$0xff] %v410_v61 }
 0x1ae   : > { %627 = shalt.err (!%p624_p3)
}
 0x1af   : > { %s665_s17 = smov 128   ;;  %s666_s20 = smov 8  }
 0x1b0   : > { %556 = dma.vmem_to_hbm [thread:$0]  (%p740_p5), %s429_s10, 512, %s431_s11, %s416_s12, %s665_s17, %s665_s17, %s666_s20  }
 0x1b1 PF: > { %p562_p4 = scmp.ge.s32.totalorder %s662_s24, 2  ;;  %s445_s26 = sand.u32 1, %s650_s21  }
 0x1b2   : > { %s446_s28 = scalar_lea.sflag [#allocation3], %s445_s26 }
 0x1b3   : > { %p559_p7 = pnand %p562_p4, %p744_p6 }
 0x1b5   : > { %p560_p8 = pneg %p559_p7 }
 0x1b7   : > { %645 = dma.done.wait (%p560_p8), %s446_s28, 512  }
 0x1b8   : > { %647 = vsyncadd (%p560_p8), %s446_s28, 4294966784  ;;  %p16_p9 = scmp.ge.s32.totalorder %s727_s27, 4   ;;  %s878_s21 = smov %s654_s22 }
 0x1b9   : > { %s879_s22 = smov %s658_s23  ;;  %s880_s23 = smov %s738_s30 }
 0x1ba   : > { %s881_s24 = smov %s727_s27  ;;  %18 = sbr.rel (!%p16_p9) target bundleno = 3 (0x3), region = 82 }
 0x1bf   :  { %452 = vsyncpa [#allocation3], 1 }
 0x1c0   :  { %454 = vsyncpa [#allocation3 + $0x1], 1 }

</bundles_post_ra>
